<compile_context>
chip_gen: v7x
topology: tpu7x:2x2x1
jax: 0.10.0
libtpu: 0.0.40
codegen_flags: <defaults>
</compile_context>

<pallas_src>
import math
from functools import partial

import jax
import jax.numpy as jnp
from jax.experimental import pallas as pl
from jax.experimental.pallas import tpu as pltpu


# ----------------------------------------------------------------------------
# in-kernel helpers
# ----------------------------------------------------------------------------
def _gelu_erf(x):
    # Exact (erf-based) GELU matching torch.nn.GELU().  erf via the Abramowitz-Stegun
    # 7.1.26 polynomial (|err| < 1.5e-7), built from exp only so it lowers to the EUP.
    z = x * (1.0 / math.sqrt(2.0))
    a = jnp.abs(z)
    t = 1.0 / (1.0 + 0.3275911 * a)
    poly = t * (0.254829592 + t * (-0.284496736 + t * (1.421413741
             + t * (-1.453152027 + t * 1.061405429))))
    erf_abs = 1.0 - poly * jnp.exp(-a * a)
    erf = jnp.where(z >= 0.0, erf_abs, -erf_abs)
    return 0.5 * x * (1.0 + erf)


def _layer_norm_last(x, gamma, beta, eps=1e-6):
    # LayerNorm3d: normalize over channels (here the last / lane axis).
    u = jnp.mean(x, axis=-1, keepdims=True)
    d = x - u
    v = jnp.mean(d * d, axis=-1, keepdims=True)
    return d * jax.lax.rsqrt(v + eps) * gamma + beta


# ----------------------------------------------------------------------------
# Pallas kernels
# ----------------------------------------------------------------------------
def _point_pe_kernel(coords_ref, labels_ref, ga_ref, gb_ref, tbl_ref, out_ref):
    # coords_ref: (M, 3) raw coords (batch folded into rows); labels_ref: (M, 1)
    # ga_ref: (3, F) gaussian matrix with the full 2*pi*(2*(c+0.5)/size - 1) affine folded in
    # gb_ref: (1, F) matching bias row
    # tbl_ref: (3, E) = [not_a_point_embed, point_embeddings[0], point_embeddings[1]]
    c = coords_ref[...]
    g = ga_ref[...]
    # K=3 contraction as broadcast MACs on the VPU (too small for the MXU).
    proj = (gb_ref[...] + c[:, 0:1] * g[0:1, :] + c[:, 1:2] * g[1:2, :]
            + c[:, 2:3] * g[2:3, :])                        # (M, F)
    s = jnp.sin(proj)                                       # computed once, reused
    pe = jnp.concatenate([s, jnp.cos(proj), s], axis=-1)    # (M, E); [sin, cos, sin] as in ref

    lab = labels_ref[...]                                   # (M, 1)
    tbl = tbl_ref[...]
    is_pad = lab == -1.0
    out = jnp.where(is_pad, 0.0, pe)                        # zero padded points
    out = out + jnp.where(is_pad, tbl[0:1, :], 0.0)         # + not_a_point embedding
    out = out + jnp.where(lab == 0.0, tbl[1:2, :], 0.0)     # + negative point embedding
    out = out + jnp.where(lab == 1.0, tbl[2:3, :], 0.0)     # + positive point embedding
    out_ref[...] = out


def _mask_downscale_kernel(p1_ref, w1_ref, par1_ref, w2_ref, par2_ref, w3_ref,
                           b3_ref, out_ref, *, batch, s2):
    # p1_ref : (8, B*S2, 8)  leading axis = first-stage slot (kd1,kh1,kw1),
    #                        rows = (b, d2, h2, w2), channels = voxel (kd0,kh0,kw0)
    # w1_ref : (8, c1)       Conv3d(1, c1, k=2, s=2) as a patch-matmul matrix
    # par1_ref: (3, c1)      rows = [bias1, ln1_weight, ln1_bias]
    # w2_ref : (8*c1, mic)   Conv3d(c1, mic, k=2, s=2); rows ordered (kd1, kh1, kw1, c1)
    # par2_ref: (3, mic)     rows = [bias2, ln2_weight, ln2_bias]
    # w3_ref : (mic, E)      1x1x1 projection
    # b3_ref : (E, 1)        projection bias as a column (output is channels-first)
    # out_ref: (B, E, S2)
    w1 = w1_ref[...]
    b1 = par1_ref[0:1, :]
    g1 = par1_ref[1:2, :]
    be1 = par1_ref[2:3, :]

    # Stage 1: conv1 + LayerNorm3d + GELU, one 2x2x2 slot at a time (K=8 stays on the
    # VPU as broadcast MACs).  Thanks to the two-level row ordering, the second-stage
    # 2x2x2 regroup is just a channel concat here in VMEM.
    pieces = []
    for k1 in range(8):
        xk = p1_ref[k1]                                     # (B*S2, 8)
        y = b1 + xk[:, 0:1] * w1[0:1, :]
        for j in range(1, 8):
            y = y + xk[:, j:j + 1] * w1[j:j + 1, :]
        y = _layer_norm_last(y, g1, be1)
        pieces.append(_gelu_erf(y))
    p2 = jnp.concatenate(pieces, axis=-1)                   # (B*S2, 8*c1)

    # Stage 2: conv2 (patch matmul) + LayerNorm3d + GELU.
    z = jnp.dot(p2, w2_ref[...], preferred_element_type=jnp.float32) + par2_ref[0:1, :]
    z = _gelu_erf(_layer_norm_last(z, par2_ref[1:2, :], par2_ref[2:3, :]))

    # Stage 3: 1x1x1 projection, emitted channels-first (E in sublanes, spatial in lanes).
    o = jnp.dot(z, w3_ref[...], preferred_element_type=jnp.float32)   # (B*S2, E)
    ot = o.T + b3_ref[...]                                            # (E, B*S2)
    for b in range(batch):
        out_ref[b] = ot[:, b * s2:(b + 1) * s2]


# ----------------------------------------------------------------------------
# pallas_call wrappers
# ----------------------------------------------------------------------------
_ARB1 = pltpu.CompilerParams(dimension_semantics=("arbitrary",))


def _point_pe_pallas(coords2d, labels2d, gauss_aff, gauss_bias, embed_tbl):
    M = coords2d.shape[0]
    F = gauss_aff.shape[1]
    E = embed_tbl.shape[1]
    fixed = lambda i: (0, 0)
    return pl.pallas_call(
        _point_pe_kernel,
        out_shape=jax.ShapeDtypeStruct((M, E), jnp.float32),
        grid=(1,),
        in_specs=[
            pl.BlockSpec((M, 3), fixed),
            pl.BlockSpec((M, 1), fixed),
            pl.BlockSpec((3, F), fixed),
            pl.BlockSpec((1, F), fixed),
            pl.BlockSpec((3, E), fixed),
        ],
        out_specs=pl.BlockSpec((M, E), fixed),
        compiler_params=_ARB1,
    )(coords2d, labels2d, gauss_aff, gauss_bias, embed_tbl)


def _mask_downscale_pallas(p1, w1, par1, w2, par2, w3, b3col, batch, s2):
    _, M2, _ = p1.shape
    c1 = w1.shape[1]
    mic = w2.shape[1]
    E = w3.shape[1]
    fixed2 = lambda i: (0, 0)
    fixed3 = lambda i: (0, 0, 0)
    return pl.pallas_call(
        partial(_mask_downscale_kernel, batch=batch, s2=s2),
        out_shape=jax.ShapeDtypeStruct((batch, E, s2), jnp.float32),
        grid=(1,),
        in_specs=[
            pl.BlockSpec((8, M2, 8), fixed3),
            pl.BlockSpec((8, c1), fixed2),
            pl.BlockSpec((3, c1), fixed2),
            pl.BlockSpec((8 * c1, mic), fixed2),
            pl.BlockSpec((3, mic), fixed2),
            pl.BlockSpec((mic, E), fixed2),
            pl.BlockSpec((E, 1), fixed2),
        ],
        out_specs=pl.BlockSpec((batch, E, s2), fixed3),
        compiler_params=_ARB1,
    )(p1, w1, par1, w2, par2, w3, b3col)


# ----------------------------------------------------------------------------
# PromptEncoder3D (forward semantics) with deterministic synthetic parameters
# ----------------------------------------------------------------------------
class PromptEncoder3DPallas:
    def __init__(self, embed_dim, image_embedding_size, input_image_size,
                 mask_in_chans, key):
        assert embed_dim % 3 == 0, "embed_dim must be divisible by 3 (PE concat)"
        self.embed_dim = embed_dim
        self.image_embedding_size = image_embedding_size
        self.input_image_size = input_image_size
        num_pos_feats = embed_dim // 3
        c1 = mask_in_chans // 4

        ks = jax.random.split(key, 8)
        # PositionEmbeddingRandom3D buffer (scale = 1.0)
        self.gauss = jax.random.normal(ks[0], (3, num_pos_feats), jnp.float32)
        # nn.Embedding(1, embed_dim) weights packed as one table:
        # rows = [not_a_point_embed, point_embeddings[0], point_embeddings[1]]
        napt = jax.random.normal(ks[3], (1, embed_dim), jnp.float32) * 0.02
        pe0 = jax.random.normal(ks[1], (1, embed_dim), jnp.float32) * 0.02
        pe1 = jax.random.normal(ks[2], (1, embed_dim), jnp.float32) * 0.02
        self.point_tbl = jnp.concatenate([napt, pe0, pe1], axis=0)          # (3, E)
        self.no_mask = jax.random.normal(ks[4], (1, embed_dim), jnp.float32) * 0.02

        # mask_downscaling parameters, stored as patch-matmul matrices.  For real
        # PyTorch weights the correspondence is:
        #   w1[(kd,kh,kw), oc]       = conv1.weight[oc, 0, kd, kh, kw]
        #   w2[(kd,kh,kw)*c1+ic, oc] = conv2.weight[oc, ic, kd, kh, kw]
        #   w3[ic, oc]               = conv3.weight[oc, ic, 0, 0, 0]
        self.w1 = jax.random.normal(ks[5], (8, c1), jnp.float32) * 0.1
        self.par1 = jnp.stack([jnp.zeros((c1,)), jnp.ones((c1,)),
                               jnp.zeros((c1,))]).astype(jnp.float32)        # [b, ln_w, ln_b]
        self.w2 = jax.random.normal(ks[6], (8 * c1, mask_in_chans), jnp.float32) * 0.1
        self.par2 = jnp.stack([jnp.zeros((mask_in_chans,)), jnp.ones((mask_in_chans,)),
                               jnp.zeros((mask_in_chans,))]).astype(jnp.float32)
        self.w3 = jax.random.normal(ks[7], (mask_in_chans, embed_dim), jnp.float32) * 0.1
        self.b3col = jnp.zeros((embed_dim, 1), jnp.float32)

        # Fold the point-PE affine (+0.5 offset, [0,1] normalization, 2c-1, 2*pi) into the
        # gaussian matrix plus a single bias row: proj = coords @ gauss_aff + gauss_bias.
        inv_size = 1.0 / jnp.array(input_image_size, jnp.float32).reshape(3, 1)
        self.gauss_aff = (4.0 * math.pi) * self.gauss * inv_size             # (3, F)
        self.gauss_bias = (2.0 * math.pi) * jnp.sum(
            self.gauss * (inv_size - 1.0), axis=0, keepdims=True)            # (1, F)

    # ------------------------------------------------------------------
    def _get_batch_size(self, points, boxes, masks):
        if points is not None:
            return points[0].shape[0]
        if boxes is not None:
            return boxes.shape[0]
        if masks is not None:
            return masks.shape[0]
        return 1

    def _embed_points(self, coords, labels, pad):
        B, n, _ = coords.shape
        coords = coords.astype(jnp.float32)
        labels = labels.astype(jnp.float32)
        if pad:  # boxes is None -> append a "not-a-point" entry
            coords = jnp.concatenate(
                [coords, jnp.zeros((B, 1, 3), jnp.float32)], axis=1)
            labels = jnp.concatenate(
                [labels, -jnp.ones((B, 1), jnp.float32)], axis=1)
            n += 1
        out = _point_pe_pallas(coords.reshape(B * n, 3), labels.reshape(B * n, 1),
                               self.gauss_aff, self.gauss_bias, self.point_tbl)
        return out.reshape(B, n, self.embed_dim)

    def _embed_masks(self, masks):
        B = masks.shape[0]
        D, H, W = self.image_embedding_size     # mask_input_size == image_embedding_size
        D2, H2, W2 = D // 4, H // 4, W // 4
        S2 = D2 * H2 * W2
        # Single XLA regroup of the raw mask into two-level 2x2x2 patches:
        # leading axis = first-stage slot (kd1,kh1,kw1), rows = (b, d2, h2, w2),
        # channels = voxel (kd0,kh0,kw0).  Everything else runs inside one kernel.
        x = masks[:, 0].reshape(B, D2, 2, 2, H2, 2, 2, W2, 2, 2)
        #        dims:          0   1  2  3   4  5  6   7  8  9
        x = jnp.transpose(x, (2, 5, 8, 0, 1, 4, 7, 3, 6, 9))
        p1 = x.reshape(8, B * S2, 8)
        out = _mask_downscale_pallas(p1, self.w1, self.par1, self.w2, self.par2,
                                     self.w3, self.b3col, B, S2)    # (B, E, S2)
        return out.reshape(B, self.embed_dim, D2, H2, W2)           # NCDHW, no transpose

    def __call__(self, points, boxes, masks):
        bs = self._get_batch_size(points, boxes, masks)

        if points is not None:
            coords, labels = points
            sparse = self._embed_points(coords, labels, pad=boxes is None)
        else:
            sparse = jnp.zeros((bs, 0, self.embed_dim), jnp.float32)

        # TODO(synk): boxes path omitted — the reference module indexes
        # point_embeddings[2]/[3] which do not exist (num_point_embeddings == 2),
        # so it cannot execute as written; boxes must be None.

        if masks is not None:
            dense = self._embed_masks(masks)
        else:
            D, H, W = self.image_embedding_size
            dense = jnp.broadcast_to(
                self.no_mask.reshape(1, self.embed_dim, 1, 1, 1),
                (bs, self.embed_dim, D, H, W))
        return sparse, dense


# ----------------------------------------------------------------------------
if __name__ == "__main__":
    embed_dim = 48                      # divisible by 3 -> num_pos_feats = 16
    image_embedding_size = (8, 8, 8)    # mask_input_size == image_embedding_size here
    input_image_size = (32, 32, 32)
    mask_in_chans = 16
    B, n_pts = 2, 4

    enc = PromptEncoder3DPallas(embed_dim, image_embedding_size, input_image_size,
                                mask_in_chans, jax.random.PRNGKey(0))

    k1, k2, k3 = jax.random.split(jax.random.PRNGKey(0), 3)
    coords = jax.random.uniform(k1, (B, n_pts, 3), jnp.float32) * \
        jnp.array(input_image_size, jnp.float32)
    labels = jax.random.randint(k2, (B, n_pts), 0, 2).astype(jnp.float32)  # {0,1}
    masks = jax.random.normal(k3, (B, 1) + image_embedding_size, jnp.float32)

    sparse, dense = enc((coords, labels), None, masks)
    sparse = jax.block_until_ready(sparse)
    dense = jax.block_until_ready(dense)

    assert sparse.shape == (B, n_pts + 1, embed_dim), sparse.shape
    assert dense.shape == (B, embed_dim, 2, 2, 2), dense.shape
    assert bool(jnp.all(jnp.isfinite(sparse))) and bool(jnp.all(jnp.isfinite(dense)))
    print("KERNEL_OK")
</pallas_src>

<mosaic_0001>
module attributes {stable_mosaic.version = 11 : i64} {
  func.func @_point_pe_kernel(%arg0: i32, %arg1: memref<10x3xf32, #tpu.memory_space<vmem>>, %arg2: memref<10x1xf32, #tpu.memory_space<vmem>>, %arg3: memref<3x16xf32, #tpu.memory_space<vmem>>, %arg4: memref<1x16xf32, #tpu.memory_space<vmem>>, %arg5: memref<3x48xf32, #tpu.memory_space<vmem>>, %arg6: memref<10x48xf32, #tpu.memory_space<vmem>>) attributes {dimension_semantics = [#tpu.dimension_semantics<arbitrary>], iteration_bounds = array<i64: 1>, scalar_prefetch = 0 : i64, scratch_operands = 0 : i64, tpu.core_type = #tpu.core_type<tc>, window_params = [{pipeline_mode = #tpu.pipeline_mode<synchronous>, transform_indices = @transform_0, window_bounds = array<i64: 10, 3>}, {pipeline_mode = #tpu.pipeline_mode<synchronous>, transform_indices = @transform_1, window_bounds = array<i64: 10, 1>}, {pipeline_mode = #tpu.pipeline_mode<synchronous>, transform_indices = @transform_2, window_bounds = array<i64: 3, 16>}, {pipeline_mode = #tpu.pipeline_mode<synchronous>, transform_indices = @transform_3, window_bounds = array<i64: 1, 16>}, {pipeline_mode = #tpu.pipeline_mode<synchronous>, transform_indices = @transform_4, window_bounds = array<i64: 3, 48>}, {pipeline_mode = #tpu.pipeline_mode<synchronous>, transform_indices = @transform_5, window_bounds = array<i64: 10, 48>}]} {
    %c0 = arith.constant 0 : index
    %c0_0 = arith.constant 0 : index
    %0 = vector.load %arg1[%c0, %c0_0] : memref<10x3xf32, #tpu.memory_space<vmem>>, vector<10x3xf32>
    %c0_1 = arith.constant 0 : index
    %c0_2 = arith.constant 0 : index
    %1 = vector.load %arg3[%c0_1, %c0_2] : memref<3x16xf32, #tpu.memory_space<vmem>>, vector<3x16xf32>
    %c0_3 = arith.constant 0 : index
    %c0_4 = arith.constant 0 : index
    %2 = vector.load %arg4[%c0_3, %c0_4] : memref<1x16xf32, #tpu.memory_space<vmem>>, vector<1x16xf32>
    %3 = vector.extract_strided_slice %0 {offsets = [0, 0], sizes = [10, 1], strides = [1, 1]} : vector<10x3xf32> to vector<10x1xf32>
    %4 = vector.extract_strided_slice %1 {offsets = [0, 0], sizes = [1, 16], strides = [1, 1]} : vector<3x16xf32> to vector<1x16xf32>
    %5 = vector.broadcast %3 : vector<10x1xf32> to vector<10x16xf32>
    %6 = vector.broadcast %4 : vector<1x16xf32> to vector<10x16xf32>
    %7 = arith.mulf %5, %6 : vector<10x16xf32>
    %8 = vector.broadcast %2 : vector<1x16xf32> to vector<10x16xf32>
    %9 = arith.addf %8, %7 : vector<10x16xf32>
    %10 = vector.extract_strided_slice %0 {offsets = [0, 1], sizes = [10, 1], strides = [1, 1]} : vector<10x3xf32> to vector<10x1xf32>
    %11 = vector.extract_strided_slice %1 {offsets = [1, 0], sizes = [1, 16], strides = [1, 1]} : vector<3x16xf32> to vector<1x16xf32>
    %12 = vector.broadcast %10 : vector<10x1xf32> to vector<10x16xf32>
    %13 = vector.broadcast %11 : vector<1x16xf32> to vector<10x16xf32>
    %14 = arith.mulf %12, %13 : vector<10x16xf32>
    %15 = arith.addf %9, %14 : vector<10x16xf32>
    %16 = vector.extract_strided_slice %0 {offsets = [0, 2], sizes = [10, 1], strides = [1, 1]} : vector<10x3xf32> to vector<10x1xf32>
    %17 = vector.extract_strided_slice %1 {offsets = [2, 0], sizes = [1, 16], strides = [1, 1]} : vector<3x16xf32> to vector<1x16xf32>
    %18 = vector.broadcast %16 : vector<10x1xf32> to vector<10x16xf32>
    %19 = vector.broadcast %17 : vector<1x16xf32> to vector<10x16xf32>
    %20 = arith.mulf %18, %19 : vector<10x16xf32>
    %21 = arith.addf %15, %20 : vector<10x16xf32>
    %22 = math.sin %21 : vector<10x16xf32>
    %23 = math.cos %21 : vector<10x16xf32>
    %24 = tpu.concatenate %22, %23, %22 in 1 : vector<10x16xf32>, vector<10x16xf32>, vector<10x16xf32> -> vector<10x48xf32>
    %c0_5 = arith.constant 0 : index
    %c0_6 = arith.constant 0 : index
    %25 = vector.load %arg2[%c0_5, %c0_6] : memref<10x1xf32, #tpu.memory_space<vmem>>, vector<10x1xf32>
    %c0_7 = arith.constant 0 : index
    %c0_8 = arith.constant 0 : index
    %26 = vector.load %arg5[%c0_7, %c0_8] : memref<3x48xf32, #tpu.memory_space<vmem>>, vector<3x48xf32>
    %cst = arith.constant -1.000000e+00 : f32
    %27 = vector.broadcast %cst : f32 to vector<10x1xf32>
    %28 = arith.cmpf oeq, %25, %27 : vector<10x1xf32>
    %cst_9 = arith.constant 0.000000e+00 : f32
    %29 = vector.shape_cast %28 : vector<10x1xi1> to vector<10x1xi1>
    %30 = vector.broadcast %29 : vector<10x1xi1> to vector<10x48xi1>
    %31 = vector.broadcast %cst_9 : f32 to vector<10x48xf32>
    %32 = arith.select %30, %31, %24 : vector<10x48xi1>, vector<10x48xf32>
    %33 = vector.extract_strided_slice %26 {offsets = [0, 0], sizes = [1, 48], strides = [1, 1]} : vector<3x48xf32> to vector<1x48xf32>
    %cst_10 = arith.constant 0.000000e+00 : f32
    %34 = vector.shape_cast %28 : vector<10x1xi1> to vector<10x1xi1>
    %35 = vector.broadcast %34 : vector<10x1xi1> to vector<10x48xi1>
    %36 = vector.shape_cast %33 : vector<1x48xf32> to vector<1x48xf32>
    %37 = vector.broadcast %36 : vector<1x48xf32> to vector<10x48xf32>
    %38 = vector.broadcast %cst_10 : f32 to vector<10x48xf32>
    %39 = arith.select %35, %37, %38 : vector<10x48xi1>, vector<10x48xf32>
    %40 = arith.addf %32, %39 : vector<10x48xf32>
    %cst_11 = arith.constant 0.000000e+00 : f32
    %41 = vector.broadcast %cst_11 : f32 to vector<10x1xf32>
    %42 = arith.cmpf oeq, %25, %41 : vector<10x1xf32>
    %43 = vector.extract_strided_slice %26 {offsets = [1, 0], sizes = [1, 48], strides = [1, 1]} : vector<3x48xf32> to vector<1x48xf32>
    %cst_12 = arith.constant 0.000000e+00 : f32
    %44 = vector.shape_cast %42 : vector<10x1xi1> to vector<10x1xi1>
    %45 = vector.broadcast %44 : vector<10x1xi1> to vector<10x48xi1>
    %46 = vector.shape_cast %43 : vector<1x48xf32> to vector<1x48xf32>
    %47 = vector.broadcast %46 : vector<1x48xf32> to vector<10x48xf32>
    %48 = vector.broadcast %cst_12 : f32 to vector<10x48xf32>
    %49 = arith.select %45, %47, %48 : vector<10x48xi1>, vector<10x48xf32>
    %50 = arith.addf %40, %49 : vector<10x48xf32>
    %cst_13 = arith.constant 1.000000e+00 : f32
    %51 = vector.broadcast %cst_13 : f32 to vector<10x1xf32>
    %52 = arith.cmpf oeq, %25, %51 : vector<10x1xf32>
    %53 = vector.extract_strided_slice %26 {offsets = [2, 0], sizes = [1, 48], strides = [1, 1]} : vector<3x48xf32> to vector<1x48xf32>
    %cst_14 = arith.constant 0.000000e+00 : f32
    %54 = vector.shape_cast %52 : vector<10x1xi1> to vector<10x1xi1>
    %55 = vector.broadcast %54 : vector<10x1xi1> to vector<10x48xi1>
    %56 = vector.shape_cast %53 : vector<1x48xf32> to vector<1x48xf32>
    %57 = vector.broadcast %56 : vector<1x48xf32> to vector<10x48xf32>
    %58 = vector.broadcast %cst_14 : f32 to vector<10x48xf32>
    %59 = arith.select %55, %57, %58 : vector<10x48xi1>, vector<10x48xf32>
    %60 = arith.addf %50, %59 : vector<10x48xf32>
    %c0_15 = arith.constant 0 : index
    %c0_16 = arith.constant 0 : index
    %61 = vector.load %arg6[%c0_15, %c0_16] : memref<10x48xf32, #tpu.memory_space<vmem>>, vector<10x48xf32>
    tpu.vector_store %arg6[%c0_15, %c0_16], %60 {strides = array<i32>} : memref<10x48xf32, #tpu.memory_space<vmem>>, vector<10x48xf32>,
    return
  }
  func.func @transform_0(%arg0: i32) -> (i32, i32) {
    %c0_i32 = arith.constant 0 : i32
    %c0_i32_0 = arith.constant 0 : i32
    %c0_i32_1 = arith.constant 0 : i32
    return %c0_i32, %c0_i32_0 : i32, i32
  }
  func.func @transform_1(%arg0: i32) -> (i32, i32) {
    %c0_i32 = arith.constant 0 : i32
    %c0_i32_0 = arith.constant 0 : i32
    %c0_i32_1 = arith.constant 0 : i32
    return %c0_i32, %c0_i32_0 : i32, i32
  }
  func.func @transform_2(%arg0: i32) -> (i32, i32) {
    %c0_i32 = arith.constant 0 : i32
    %c0_i32_0 = arith.constant 0 : i32
    %c0_i32_1 = arith.constant 0 : i32
    return %c0_i32, %c0_i32_0 : i32, i32
  }
  func.func @transform_3(%arg0: i32) -> (i32, i32) {
    %c0_i32 = arith.constant 0 : i32
    %c0_i32_0 = arith.constant 0 : i32
    %c0_i32_1 = arith.constant 0 : i32
    return %c0_i32, %c0_i32_0 : i32, i32
  }
  func.func @transform_4(%arg0: i32) -> (i32, i32) {
    %c0_i32 = arith.constant 0 : i32
    %c0_i32_0 = arith.constant 0 : i32
    %c0_i32_1 = arith.constant 0 : i32
    return %c0_i32, %c0_i32_0 : i32, i32
  }
  func.func @transform_5(%arg0: i32) -> (i32, i32) {
    %c0_i32 = arith.constant 0 : i32
    %c0_i32_0 = arith.constant 0 : i32
    %c0_i32_1 = arith.constant 0 : i32
    return %c0_i32, %c0_i32_0 : i32, i32
  }
}

</mosaic_0001>

<bundles_post_ra>
// kernel: tpu_custom_call.1
= control target key start
LH: loop header
LB: loop body
LE: loop exit
PB: predicated region body
PF: predicated region fallthrough
CT: control target
= control target key end

     0   :  { %v679_v1 = vmov 1   ;;  %v680_v2 = vmov 0   ;;  %s848_s0 = inlined_call_operand.vmem [shape: f32[10,3], index: 0, kind: input, shape index: {}]   ;;  %s849_s1 = inlined_call_operand.vmem [shape: f32[10,1], index: 1, kind: input, shape index: {}]   ;;  %s850_s2 = inlined_call_operand.vmem [shape: f32[3,16], index: 2, kind: input, shape index: {}]   ;;  %s851_s3 = inlined_call_operand.vmem [shape: f32[1,16], index: 3, kind: input, shape index: {}]   ;;  %s852_s4 = inlined_call_operand.vmem [shape: f32[3,48], index: 4, kind: input, shape index: {}]   ;;  %s853_s5 = inlined_call_operand.hbm [shape: f32[10,48], index: 5, kind: output, shape index: {}]  }
   0x1   :  { %v21_v0 = vld [vmem:[%s848_s0] sm:$0xff]  ;;  %642 = vset.pattern.permute.xlu1 %v679_v1  ;;  %641 = vset.pattern.permute.xlu0 %v680_v2 }
   0x2   :  { %10 = vsyncpa [#allocation3], 0  ;;  %50 = vperm.xlu1 %642, %v21_v0   ;;  %27 = vperm.xlu0 %641, %v21_v0   ;;  %v22_v3 = vld [vmem:[%s848_s0 + $0x8] sm:$0x3]  ;;  %v681_v4 = vmov 2   ;;  %v517_v5 = vld [vmem:[%s849_s1] sm:$0xff]  ;;  %v35_v13 = vlaneseq }
   0x3   :  { %vm520_vm0 = vcmp.eq.f32.partialorder %v517_v5, -1.0  ;;  %vm542_vm1 = vcmp.eq.f32.partialorder %v517_v5, 0.0  ;;  %v518_v7 = vld [vmem:[%s849_s1 + $0x8] sm:$0x3]  ;;  %vm562_vm3 = vcmp.eq.f32.partialorder %v517_v5, 1.0 }
   0x4   :  { %v522_v6 = vsel %vm520_vm0, 1, %v680_v2  ;;  %vm521_vm2 = vcmp.eq.f32.partialorder %v518_v7, -1.0  ;;  %v544_v8 = vsel %vm542_vm1, 1, %v680_v2  ;;  %vm543_vm4 = vcmp.eq.f32.partialorder %v518_v7, 0.0  ;;  %v23_v16 = vld [vmem:[%s850_s2] sm:$0x7] }
   0x5   :  { %v523_v9 = vsel %vm521_vm2, 1, %v680_v2  ;;  %v564_v10 = vsel %vm562_vm3, 1, %v680_v2  ;;  %v545_v11 = vsel %vm543_vm4, 1, %v680_v2  ;;  %vm563_vm5 = vcmp.eq.f32.partialorder %v518_v7, 1.0  ;;  %v602_v23 = vld [vmem:[%s851_s3] ss:$0 sm:$0xff] }
   0x6   :  { %54 = vperm.xlu1 %642, %v22_v3   ;;  %32 = vperm.xlu0 %641, %v22_v3   ;;  %v565_v12 = vsel %vm563_vm5, 1, %v680_v2  ;;  %v735_v14 = vshrl.u32 %v35_v13, 7  ;;  %v682_v63 = vmov 2102212464   ;;  %v683_v1 = vmov 920167782  }
   0x7   :  { %v684_v5 = vmov 1326507024   ;;  %v686_v13 = vmov 2475754826   ;;  %s688_s2 = smov 16   ;;  %s689_s3 = smov 32  }
   0x8   :  { %v37_v15 = vsub.s32 0, %v735_v14  ;;  %v59_v18 = vsub.s32 1, %v735_v14  ;;  %v75_v22 = vsub.s32 2, %v735_v14 }
   0xa   :  { %644 = vset.pattern.permute.xlu1 %v681_v4  ;;  %643 = vset.pattern.permute.xlu0 %v681_v4  ;;  %v38_v17 = vrot.slane %v23_v16, %v37_v15  ;;  %v60_v24 = vrot.slane %v23_v16, %v59_v18  ;;  %v76_v29 = vrot.slane %v23_v16, %v75_v22 }
   0xb   :  { %70 = vperm.xlu1 %644, %v22_v3   ;;  %66 = vperm.xlu0 %643, %v21_v0  }
   0xf   :  { %645 = vset.pattern.permute.xlu1 %v680_v2  ;;  %646 = vset.pattern.permute.xlu0 %v680_v2 }
  0x10   :  { %525 = vperm.xlu1 %645, %v522_v6   ;;  %528 = vperm.xlu0 %646, %v523_v9  }
  0x14   :  { %547 = vperm.xlu1 %645, %v544_v8   ;;  %567 = vperm.xlu0 %646, %v564_v10  }
  0x18   :  { %550 = vperm.xlu1 %645, %v545_v11   ;;  %v685_v11 = vmov 683565275  }
  0x1c   :  { %570 = vperm.xlu1 %645, %v565_v12  }
  0x81   :  { %v51_v19 = vpop.permute.xlu1 %50  ;;  %v28_v20 = vpop.permute.xlu0 %27 }
  0x82   :  { %v39_v21 = vmul.f32 %v38_v17, %v28_v20  ;;  %v61_v32 = vmul.f32 %v60_v24, %v51_v19 }
  0x84   :  { %v47_v28 = vadd.f32 %v602_v23, %v39_v21  ;;  %v687_v21 = vmov 2131351028  }
  0x85   :  { %v55_v25 = vpop.permute.xlu1 %54  ;;  %v33_v26 = vpop.permute.xlu0 %32 }
  0x86   :  { %v40_v27 = vmul.f32 %v38_v17, %v33_v26  ;;  %v62_v30 = vmul.f32 %v60_v24, %v55_v25  ;;  %v63_v37 = vadd.f32 %v61_v32, %v47_v28 }
  0x88   :  { %v48_v31 = vadd.f32 %v602_v23, %v40_v27 }
  0x8a   :  { %v71_v33 = vpop.permute.xlu1 %70  ;;  %v64_v34 = vadd.f32 %v62_v30, %v48_v31  ;;  %v67_v35 = vpop.permute.xlu0 %66 }
  0x8b   :  { %v78_v36 = vmul.f32 %v76_v29, %v71_v33  ;;  %v77_v38 = vmul.f32 %v76_v29, %v67_v35 }
  0x8d   :  { %v752_v39 = vadd.f32 %v78_v36, %v64_v34  ;;  %v754_v40 = vadd.f32 %v77_v38, %v63_v37 }
  0x8f   :  { %v188_v41 = vand.u32 2139095040, %v752_v39  ;;  %v84_v42 = vand.u32 2139095040, %v754_v40  ;;  %v185_v43 = vand.u32 2147483647, %v752_v39  ;;  %v81_v49 = vand.u32 2147483647, %v754_v40 }
  0x90   :  { %vm187_vm4 = vcmp.lt.s32.totalorder %v752_v39, 0 }
  0x91   :  { %v189_v44 = vshrl.u32 %v188_v41, 23  ;;  %v85_v45 = vshrl.u32 %v84_v42, 23  ;;  %v192_v48 = vand.u32 8388607, %v185_v43  ;;  %v764_v53 = vand.u32 8388607, %v81_v49 }
  0x92   :  { %vm186_vm5 = vcmp.le.f32.partialorder %v185_v43, 0.7853982 }
  0x93   :  { %v607_v46 = vadd.s32 4294967169, %v189_v44  ;;  %v603_v47 = vadd.s32 4294967169, %v85_v45  ;;  %v193_v52 = vor.u32 8388608, %v192_v48  ;;  %v89_v62 = vor.u32 8388608, %v764_v53 }
  0x95   :  { %v195_v50 = vadd.s32 1, %v607_v46  ;;  %v91_v51 = vadd.s32 1, %v603_v47  ;;  %v768_v61 = vshll.u32 %v193_v52, 8 }
  0x97   :  { %vm196_vm6 = vcmp.gt.s32.totalorder %v195_v50, 0  ;;  %vm92_vm7 = vcmp.gt.s32.totalorder %v91_v51, 0 }
  0x98   :  { %v197_v54 = vsel %vm196_vm6, %v195_v50, 0  ;;  %v93_v55 = vsel %vm92_vm7, %v91_v51, 0  ;;  %vm83_vm6 = vcmp.lt.s32.totalorder %v754_v40, 0  ;;  %vm82_vm7 = vcmp.le.f32.partialorder %v81_v49, 0.7853982 }
  0x99   :  { %v198_v56 = vshrl.u32 %v197_v54, 5  ;;  %v199_v57 = vand.u32 31, %v197_v54  ;;  %v95_v58 = vand.u32 31, %v93_v55  ;;  %v766_v60 = vshrl.u32 %v93_v55, 5 }
  0x9b   :  { %v200_v59 = vsub.s32 32, %v199_v57  ;;  %v211_v0 = vshll.u32 %v682_v63, %v199_v57  ;;  %v214_v2 = vshll.u32 %v683_v1, %v199_v57  ;;  %vm220_vm8 = vcmp.lt.s32.totalorder %v198_v56, 4 }
  0x9c   :  { %v96_v3 = vsub.s32 32, %v95_v58  ;;  %v107_v7 = vshll.u32 %v682_v63, %v95_v58  ;;  %v110_v8 = vshll.u32 %v683_v1, %v95_v58  ;;  %v202_v12 = vshll.u32 %v685_v11, %v199_v57 }
  0x9d   :  { %v212_v4 = vshrl.u32 %v683_v1, %v200_v59  ;;  %v215_v6 = vshrl.u32 %v684_v5, %v200_v59  ;;  %v203_v16 = vshrl.u32 %v686_v13, %v200_v59  ;;  %v205_v20 = vshll.u32 %v686_v13, %v199_v57 }
  0x9e   :  { %v108_v9 = vshrl.u32 %v683_v1, %v96_v3  ;;  %v111_v10 = vshrl.u32 %v684_v5, %v96_v3  ;;  %v206_v23 = vshrl.u32 %v687_v21, %v200_v59  ;;  %vm116_vm9 = vcmp.lt.s32.totalorder %v766_v60, 4 }
  0x9f   :  { %v213_v17 = vor.u32 %v212_v4, %v211_v0  ;;  %v216_v19 = vor.u32 %v215_v6, %v214_v2  ;;  %v204_v24 = vor.u32 %v203_v16, %v202_v12  ;;  %v208_v25 = vshll.u32 %v687_v21, %v199_v57 }
  0xa0   :  { %v209_v26 = vshrl.u32 %v682_v63, %v200_v59  ;;  %v201_v29 = vshrl.u32 %v685_v11, %v200_v59  ;;  %v207_v30 = vor.u32 %v206_v23, %v205_v20  ;;  %v109_v31 = vor.u32 %v108_v9, %v107_v7 }
  0xa1   :  { %v226_v27 = vsel %vm220_vm8, %v213_v17, 920167782  ;;  %v230_v28 = vsel %vm220_vm8, %v216_v19, 1326507024  ;;  %v112_v32 = vor.u32 %v111_v10, %v110_v8  ;;  %vm217_vm10 = vcmp.lt.s32.totalorder %v198_v56, 1 }
  0xa2   :  { %v210_v33 = vor.u32 %v209_v26, %v208_v25  ;;  %vm218_vm11 = vcmp.lt.s32.totalorder %v198_v56, 2  ;;  %vm219_vm12 = vcmp.lt.s32.totalorder %v198_v56, 3  ;;  %v221_v34 = vsel %vm217_vm10, %v201_v29, %v204_v24 }
  0xa3   :  { %v225_v35 = vsel %vm217_vm10, %v204_v24, %v207_v30  ;;  %v231_v41 = vsel %vm219_vm12, %v213_v17, %v230_v28  ;;  %v98_v46 = vshll.u32 %v685_v11, %v95_v58  ;;  %v99_v51 = vshrl.u32 %v686_v13, %v96_v3 }
  0xa4   :  { %v222_v36 = vsel %vm220_vm8, %v210_v33, 2102212464  ;;  %v227_v37 = vsel %vm219_vm12, %v210_v33, %v226_v27  ;;  %v229_v38 = vsel %vm217_vm10, %v207_v30, %v210_v33  ;;  %v126_v52 = vsel %vm116_vm9, %v112_v32, 1326507024 }
  0xa5   :  { %v223_v42 = vsel %vm219_vm12, %v207_v30, %v222_v36  ;;  %v228_v44 = vsel %vm218_vm11, %v225_v35, %v227_v37  ;;  %v232_v45 = vsel %vm218_vm11, %v229_v38, %v231_v41  ;;  %v101_v55 = vshll.u32 %v686_v13, %v95_v58 }
  0xa6   :  { %v224_v47 = vsel %vm218_vm11, %v221_v34, %v223_v42  ;;  %v776_v48 = vmul.u32.u64.low %v768_v61, %v232_v45  ;;  %v777_v50 = vmul.u32.u64.high %v768_v61, %v232_v45, %v776_v48  ;;  %v100_v56 = vor.u32 %v99_v51, %v98_v46 }
  0xa7   :  { %v782_v53 = vmul.u32.u64.low %v768_v61, %v228_v44  ;;  %v783_v54 = vmul.u32.u64.high %v768_v61, %v228_v44, %v782_v53  ;;  %v102_v57 = vshrl.u32 %v687_v21, %v96_v3  ;;  %v104_v59 = vshll.u32 %v687_v21, %v95_v58 }
  0xa8   :  { %v105_v0 = vshrl.u32 %v682_v63, %v96_v3  ;;  %v122_v1 = vsel %vm116_vm9, %v109_v31, 920167782  ;;  %v240_v2 = vmul.u32 %v768_v61, %v224_v47  ;;  %v97_v4 = vshrl.u32 %v685_v11, %v96_v3 }
  0xa9   :  { %v129_v5 = vshll.u32 %v89_v62, 8  ;;  %vm242_vm13 = vc.u32 %v777_v50, %v782_v53  ;;  %v103_v6 = vor.u32 %v102_v57, %v101_v55  ;;  %vm115_vm14 = vcmp.lt.s32.totalorder %v766_v60, 3 }
  0xaa   :  { %v106_v7 = vor.u32 %v105_v0, %v104_v59  ;;  %v243_v8 = vadd.s32 1, %v783_v54  ;;  %vm113_vm15 = vcmp.lt.s32.totalorder %v766_v60, 1  ;;  %vm114_vm0 = vcmp.lt.s32.totalorder %v766_v60, 2 }
  0xab   :  { %v127_v58 = vsel %vm115_vm14, %v109_v31, %v126_v52  ;;  %v121_v9 = vsel %vm113_vm15, %v100_v56, %v103_v6  ;;  %v117_v10 = vsel %vm113_vm15, %v97_v4, %v100_v56  ;;  %v241_v44 = vadd.s32 %v782_v53, %v777_v50 }
  0xac   :  { %v118_v63 = vsel %vm116_vm9, %v106_v7, 2102212464  ;;  %v123_v61 = vsel %vm115_vm14, %v106_v7, %v122_v1  ;;  %v125_v3 = vsel %vm113_vm15, %v103_v6, %v106_v7  ;;  %v244_v62 = vsel %vm242_vm13, %v243_v8, %v783_v54 }
  0xad   :  { %v124_v11 = vsel %vm114_vm0, %v121_v9, %v123_v61  ;;  %v128_v12 = vsel %vm114_vm0, %v125_v3, %v127_v58  ;;  %v245_v13 = vadd.s32 %v244_v62, %v240_v2  ;;  %v119_v16 = vsel %vm115_vm14, %v103_v6, %v118_v63 }
  0xae   :  { %v800_v17 = vmul.u32.u64.low %v129_v5, %v128_v12  ;;  %v801_v19 = vmul.u32.u64.high %v129_v5, %v128_v12, %v800_v17  ;;  %v803_v20 = vmul.u32.u64.low %v129_v5, %v124_v11  ;;  %v804_v21 = vmul.u32.u64.high %v129_v5, %v124_v11, %v803_v20 }
  0xaf   :  { %v246_v23 = vadd.s32 536870912, %v245_v13  ;;  %v120_v24 = vsel %vm114_vm0, %v117_v10, %v119_v16  ;;  %vm277_vm13 = vweird.f32 %v752_v39 }
  0xb0   :  { %vm138_vm1 = vc.u32 %v801_v19, %v803_v20  ;;  %v139_v26 = vadd.s32 1, %v804_v21  ;;  %v136_v28 = vmul.u32 %v129_v5, %v120_v24  ;;  %v137_v4 = vadd.s32 %v803_v20, %v801_v19 }
  0xb1   :  { %v247_v25 = vshrl.u32 %v246_v23, 30 }
  0xb2   :  { %v140_v29 = vsel %vm138_vm1, %v139_v26, %v804_v21 }
  0xb3   :  { %v248_v27 = vshll.u32 %v247_v25, 30  ;;  %v141_v31 = vadd.s32 %v140_v29, %v136_v28  ;;  %v271_v53 = vsub.s32 4, %v247_v25 }
  0xb5   :  { %v249_v30 = vsub.s32 %v245_v13, %v248_v27  ;;  %v142_v33 = vadd.s32 536870912, %v141_v31  ;;  %v272_v62 = vsel %vm187_vm4, %v271_v53, %v247_v25 }
  0xb6   :  { %v274_v16 = vsel %vm186_vm5, 0, %v272_v62 }
  0xb7   :  { %v251_v32 = vsub.s32 0, %v249_v30  ;;  %v143_v35 = vshrl.u32 %v142_v33, 30  ;;  %v278_v21 = vadd.s32 3, %v274_v16  ;;  %v485_v23 = vand.u32 3, %v274_v16 }
  0xb9   :  { %v608_v34 = vmin.u32 %v251_v32, %v249_v30  ;;  %v144_v37 = vshll.u32 %v143_v35, 30  ;;  %v167_v19 = vsub.s32 4, %v143_v35  ;;  %v279_v26 = vand.u32 3, %v278_v21 }
  0xba   :  { %vm486_vm8 = vcmp.lt.s32.totalorder %v485_v23, 2  ;;  %vm490_vm9 = vcmp.eq.s32.totalorder %v485_v23, 2  ;;  %vm487_vm10 = vcmp.eq.s32.totalorder %v485_v23, 0 }
  0xbb   :  { %v253_v36 = vclz %v608_v34  ;;  %v145_v60 = vsub.s32 %v141_v31, %v144_v37  ;;  %v168_v24 = vsel %vm83_vm6, %v167_v19, %v143_v35  ;;  %vm281_vm11 = vcmp.eq.s32.totalorder %v279_v26, 0 }
  0xbc   :  { %vm284_vm12 = vcmp.eq.s32.totalorder %v279_v26, 2  ;;  %vm280_vm14 = vcmp.lt.s32.totalorder %v279_v26, 2 }
  0xbd   :  { %v609_v38 = vadd.s32 4294967294, %v253_v36  ;;  %v147_v42 = vsub.s32 0, %v145_v60 }
  0xbf   :  { %vm610_vm2 = vcmp.lt.s32.totalorder %v609_v38, 0  ;;  %v604_v47 = vmin.u32 %v147_v42, %v145_v60 }
  0xc0   :  { %v256_v41 = vsel %vm610_vm2, 0, %v609_v38 }
  0xc1   :  { %v257_v45 = vsub.s32 32, %v256_v41  ;;  %v261_v46 = vsub.s32 4294967266, %v256_v41  ;;  %v258_v48 = vshll.u32 %v249_v30, %v256_v41  ;;  %v149_v54 = vclz %v604_v47 }
  0xc2   :  { %v170_v30 = vsel %vm82_vm7, 0, %v168_v24 }
  0xc3   :  { %v259_v51 = vshrl.u32 %v241_v44, %v257_v45  ;;  %v262_v52 = vadd.s32 127, %v261_v46  ;;  %v605_v57 = vadd.s32 4294967294, %v149_v54  ;;  %v174_v35 = vadd.s32 3, %v170_v30 }
  0xc4   :  { %v382_v38 = vand.u32 3, %v170_v30 }
  0xc5   :  { %v260_v55 = vor.u32 %v259_v51, %v258_v48  ;;  %v263_v56 = vshll.u32 %v262_v52, 23  ;;  %vm606_vm3 = vcmp.lt.s32.totalorder %v605_v57, 0  ;;  %v175_v41 = vand.u32 3, %v174_v35 }
  0xc6   :  { %v152_v2 = vsel %vm606_vm3, 0, %v605_v57  ;;  %vm387_vm15 = vcmp.eq.s32.totalorder %v382_v38, 2  ;;  %vm384_vm0 = vcmp.eq.s32.totalorder %v382_v38, 0  ;;  %vm383_vm3 = vcmp.lt.s32.totalorder %v382_v38, 2 }
  0xc7   :  { %v264_v59 = vor.u32 4788187, %v263_v56  ;;  %v267_v1 = vcvt.s32.f32 %v260_v55  ;;  %v153_v5 = vsub.s32 32, %v152_v2  ;;  %v157_v6 = vsub.s32 4294967266, %v152_v2 }
  0xc8   :  { %v154_v7 = vshll.u32 %v145_v60, %v152_v2  ;;  %vm177_vm1 = vcmp.eq.s32.totalorder %v175_v41, 0  ;;  %vm180_vm2 = vcmp.eq.s32.totalorder %v175_v41, 2 }
  0xc9   :  { %v265_v0 = vand.u32 2147483647, %v264_v59  ;;  %v155_v8 = vshrl.u32 %v137_v4, %v153_v5  ;;  %v158_v58 = vadd.s32 127, %v157_v6  ;;  %v526_v59 = vpop.permute.xlu1 %525  ;;  %v529_v4 = vpop.permute.xlu0 %528  ;;  %v519_v6 = vld [vmem:[%s852_s4] sm:$0x7]  ;;  %s690_s4 = smov [#allocation2]  }
  0xca   :  { %s591_s30 = sshll.u32 %s690_s4, 4  ;;  %s592_s30 = int_to_ptr.vmem [resolvable:$true] %s591_s30 }
  0xcb   :  { %v268_v50 = vmul.f32 %v267_v1, %v265_v0  ;;  %v156_v9 = vor.u32 %v155_v8, %v154_v7  ;;  %v159_v61 = vshll.u32 %v158_v58, 23  ;;  %s655_s6 = scalar_lea.vmem %s592_s30, 256  ;;  %p660_p1 = scmp.lt.s32.totalorder %s592_s30, %s592_s30 }
  0xcc   :  { %p656_p0 = scmp.ne.s32.totalorder %s592_s30, %s655_s6  ;;  %p661_p2 = scmp.lt.s32.totalorder %s655_s6, %s655_s6 }
  0xcd   :  { %v269_v63 = vxor.u32 2147483648, %v268_v50  ;;  %v160_v11 = vor.u32 4788187, %v159_v61  ;;  %v163_v13 = vcvt.s32.f32 %v156_v9  ;;  %v548_v0 = vpop.permute.xlu1 %547  ;;  %v568_v8 = vpop.permute.xlu0 %567 }
  0xce   :  { %p662_p3 = por %p661_p2, %p660_p1 }
  0xcf   :  { %v270_v3 = vsel %vm187_vm4, %v269_v63, %v268_v50  ;;  %v161_v12 = vand.u32 2147483647, %v160_v11  ;;  %vm173_vm4 = vweird.f32 %v754_v40  ;;  %v557_v50 = vrot.slane %v519_v6, %v59_v18 }
  0xd0   :  { %v273_v10 = vsel %vm186_vm5, %v752_v39, %v270_v3  ;;  %vm176_vm5 = vcmp.lt.s32.totalorder %v175_v41, 2  ;;  %v577_v63 = vrot.slane %v519_v6, %v75_v22  ;;  %p663_p4 = pnand %p662_p3, %p656_p0 }
  0xd1   :  { %647 = vcosq.f32 %v273_v10  ;;  %v164_v17 = vmul.f32 %v163_v13, %v161_v12  ;;  %v551_v1 = vpop.permute.xlu1 %550 }
  0xd2   :  { %649 = vsinq.f32 %v273_v10 }
  0xd3   :  { %v165_v20 = vxor.u32 2147483648, %v164_v17 }
  0xd5   :  { %v166_v43 = vsel %vm83_vm6, %v165_v20, %v164_v17  ;;  %v571_v2 = vpop.permute.xlu1 %570  ;;  %vm511_vm6 = vcmask 130048  }
  0xd6   :  { %v169_v25 = vsel %vm82_vm7, %v754_v40, %v166_v43  ;;  %vm514_vm7 = vcmask 261120   ;;  %v537_v40 = vrot.slane %v519_v6, %v37_v15 }
  0xd7   :  { %651 = vcosq.f32 %v169_v25 }
  0xd8   :  { %653 = vsinq.f32 %v169_v25 }
  0xdb   :  { %v648_v27 = vpop.eup %647 }
  0xdc   :  { %v650_v28 = vpop.eup %649  ;;  %v285_v29 = vxor.u32 2147483648, %v648_v27 }
  0xdd   :  { %v282_v31 = vxor.u32 2147483648, %v650_v28 }
  0xde   :  { %v492_v32 = vsel %vm490_vm9, %v285_v29, %v650_v28  ;;  %v286_v34 = vsel %vm284_vm12, %v285_v29, %v650_v28  ;;  %vm553_vm9 = vcmp.eq.s32.totalorder %v551_v1, 1  ;;  %vm530_vm12 = vcmp.eq.s32.totalorder %v526_v59, 1 }
  0xdf   :  { %v489_v49 = vsel %vm487_vm10, %v648_v27, %v282_v31  ;;  %v283_v33 = vsel %vm281_vm11, %v648_v27, %v282_v31  ;;  %vm573_vm10 = vcmp.eq.s32.totalorder %v571_v2, 1  ;;  %v559_v62 = vsel %vm553_vm9, %v557_v50, 0.0 }
  0xe0   :  { %v493_v36 = vsel %vm486_vm8, %v489_v49, %v492_v32  ;;  %v287_v60 = vsel %vm280_vm14, %v283_v33, %v286_v34  ;;  %vm531_vm8 = vcmp.eq.s32.totalorder %v529_v4, 1  ;;  %v579_v11 = vsel %vm573_vm10, %v577_v63, 0.0 }
  0xe1   :  { %v494_v37 = vsel %vm277_vm13, nan, %v493_v36  ;;  %v652_v42 = vpop.eup %651  ;;  %v288_v46 = vsel %vm277_vm13, nan, %v287_v60  ;;  %v539_v9 = vsel %vm531_vm8, %v537_v40, 0.0  ;;  %vm584_vm11 = vcmask 386048  }
  0xe2   :  { %499 = vrot.lane.b32.xlu1 %v494_v37, %s688_s2  ;;  %v654_v44 = vpop.eup %653  ;;  %v181_v45 = vxor.u32 2147483648, %v652_v42  ;;  %vm552_vm13 = vcmp.eq.s32.totalorder %v548_v0, 1  ;;  %v538_v14 = vsel %vm530_vm12, %v537_v40, 0.0  ;;  %vm572_vm14 = vcmp.eq.s32.totalorder %v568_v8, 1 }
  0xe3   :  { %v178_v47 = vxor.u32 2147483648, %v654_v44  ;;  %v558_v19 = vsel %vm552_vm13, %v557_v50, 0.0  ;;  %v578_v21 = vsel %vm572_vm14, %v577_v63, 0.0 }
  0xe4   :  { %v389_v48 = vsel %vm387_vm15, %v181_v45, %v654_v44  ;;  %v182_v52 = vsel %vm180_vm2, %v181_v45, %v654_v44  ;;  %vm582_vm15 = vcmask 392192  }
  0xe5   :  { %v386_v39 = vsel %vm384_vm0, %v652_v42, %v178_v47  ;;  %v179_v51 = vsel %vm177_vm1, %v652_v42, %v178_v47 }
  0xe6   :  { %507 = vrot.lane.b32.xlu1 %v288_v46, %s689_s3  ;;  %v390_v54 = vsel %vm383_vm3, %v386_v39, %v389_v48  ;;  %v183_v56 = vsel %vm176_vm5, %v179_v51, %v182_v52 }
  0xe7   :  { %v391_v55 = vsel %vm173_vm4, nan, %v390_v54  ;;  %v184_v57 = vsel %vm173_vm4, nan, %v183_v56 }
  0xe8   :  { %497 = vrot.lane.b32.xlu0 %v391_v55, %s688_s2 }
  0xec   :  { %505 = vrot.lane.b32.xlu0 %v184_v57, %s689_s3 }
 0x154   :  { %v500_v5 = vpop.permute.xlu1 %499 }
 0x155   :  { %v513_v53 = vsel %vm511_vm6, %v288_v46, %v500_v5 }
 0x158   :  { %v508_v7 = vpop.permute.xlu1 %507 }
 0x159   :  { %v516_v58 = vsel %vm514_vm7, %v513_v53, %v508_v7 }
 0x15a   :  { %v533_v61 = vsel %vm531_vm8, 0.0, %v516_v58  ;;  %v498_v10 = vpop.permute.xlu0 %497 }
 0x15b   :  { %v541_v3 = vadd.f32 %v539_v9, %v533_v61  ;;  %v512_v12 = vsel %vm511_vm6, %v184_v57, %v498_v10 }
 0x15d   :  { %v561_v15 = vadd.f32 %v559_v62, %v541_v3 }
 0x15e   :  { %v506_v13 = vpop.permute.xlu0 %505 }
 0x15f   :  { %v581_v18 = vadd.f32 %v579_v11, %v561_v15  ;;  %v515_v16 = vsel %vm514_vm7, %v512_v12, %v506_v13 }
 0x160   :  { %v532_v22 = vsel %vm530_vm12, 0.0, %v515_v16 }
 0x161   :  { %585 = vst.msk [vmem:[#allocation2 + $0x8] sm:$0x3] %vm584_vm11, %v581_v18  ;;  %v540_v17 = vadd.f32 %v538_v14, %v532_v22 }
 0x163   :  { %v560_v20 = vadd.f32 %v558_v19, %v540_v17 }
 0x165   :  { %v580_v43 = vadd.f32 %v578_v21, %v560_v20 }
 0x167   :  { %583 = vst.msk [vmem:[#allocation2] sm:$0xff] %vm582_vm15, %v580_v43 }
 0x168   :  { %666 = shalt.err (!%p663_p4)
}
 0x169   :  { %s667_s9 = scalar_lea.hbm %s853_s5, 256 }
 0x16a   :  { %p668_p5 = scmp.ne.s32.totalorder %s853_s5, %s667_s9  ;;  %p671_p6 = scmp.lt.u32.totalorder %s667_s9, %s853_s5 }
 0x16c   :  { %p673_p7 = pnand %p671_p6, %p668_p5 }
 0x16e   :  { %676 = shalt.err (!%p673_p7)
}
 0x16f   :  { %s691_s14 = smov 128   ;;  %s692_s15 = smov 8  }
 0x170   :  { %597 = dma.vmem_to_hbm [thread:$0]  %s592_s30, 256, %s853_s5, [#allocation3], %s691_s14, %s691_s14, %s692_s15  }
 0x171   :  { %677 = dma.done.wait [#allocation3], 256  }
 0x172   :  { %678 = vsyncadd [#allocation3], 4294967040 }
 0x173   :  { %601 = vsyncpa [#allocation3], 1 }

</bundles_post_ra>
